<compile_context>
chip_gen: v6e
topology: v6e:2x2x1
jax: 0.10.0
libtpu: 0.0.40
codegen_flags: <defaults>
</compile_context>

<pallas_src>
import functools

import numpy as np
import jax
import jax.numpy as jnp
from jax.experimental import pallas as pl
from jax.experimental.pallas import tpu as pltpu

TILE_P_MAX = 256  # cap keeps double-buffered tiles small even on v7x (64 MiB VMEM)


# ----------------------------- Pallas kernel --------------------------------

def lasm_layer_kernel(nb_ref, wwx_ref, wmat_ref, bias_ref, out_ref, *,
                      apply_elu, mxu_dtype):
    """One LASMConvssw layer tile (sum pooling, per-point bias, residual=0).

    nb_ref:   (1, max_nn, TP, in_ch)  gathered neighbor features (pad row = 0,
                                      so no explicit neighbor mask is needed)
    wwx_ref:  (max_nn, TP, K)         vertex coeffs, each repeated in_ch times
                                      along lanes (K = weight_num * in_ch);
                                      block shared across the batch grid axis
    wmat_ref: (K, out_ch)             stacked channel-mixing weights (mxu_dtype)
    bias_ref: (TP, out_ch)            per-point bias; shared across batch
    out_ref:  (1, TP, out_ch)
    """
    max_nn = nb_ref.shape[1]
    in_ch = nb_ref.shape[3]
    K = wwx_ref.shape[2]
    tp = out_ref.shape[1]

    # lane_tile[i, m*in_ch + j] = (i == j): replicates a (TP, in_ch) block
    # weight_num times along lanes via a tiny exact 0/1 MXU matmul (MXU is idle
    # here anyway), avoiding unaligned lane concatenates / reshapes.
    col = jax.lax.broadcasted_iota(jnp.int32, (in_ch, K), 1)
    row = jax.lax.broadcasted_iota(jnp.int32, (in_ch, K), 0)
    lane_tile = (col % in_ch == row).astype(jnp.float32)

    # Lane-dense neighbor fuse: one FMA on a (TP, K) tile per neighbor slot.
    fuse = jnp.zeros((tp, K), jnp.float32)
    for n in range(max_nn):                        # static unroll, max_nn small
        nb_n = nb_ref[0, n]                        # (TP, in_ch)
        nbt = jnp.dot(nb_n, lane_tile, preferred_element_type=jnp.float32)
        fuse = fuse + wwx_ref[n] * nbt             # (TP, K)

    # Single stacked-K matmul (K = weight_num * in_ch).
    acc = jnp.dot(fuse.astype(mxu_dtype), wmat_ref[...],
                  preferred_element_type=jnp.float32)
    acc = acc + bias_ref[...]

    if apply_elu:                                  # nn.ELU(alpha=1)
        acc = jnp.where(acc > 0, acc, jnp.exp(jnp.minimum(acc, 0.0)) - 1.0)

    out_ref[0] = acc.astype(out_ref.dtype)


# ------------------------------ JAX wrappers ---------------------------------

def _pick_tile_p(out_pn):
    if out_pn <= TILE_P_MAX:
        return out_pn
    t = TILE_P_MAX - (TILE_P_MAX % 8)
    while t >= 8 and out_pn % t != 0:
        t -= 8
    return t if (t >= 8 and out_pn % t == 0) else out_pn


def lasm_layer(in_pc, vcoeffs, neighbor_id, wmat_stacked, bias, *,
               is_final_layer, mxu_dtype):
    """in_pc: (B, in_pn, in_ch) -> (B, out_pn, out_ch)."""
    B, in_pn, in_ch = in_pc.shape
    out_pn, max_nn = neighbor_id.shape
    K, out_ch = wmat_stacked.shape

    # --- glue (plain JAX, fused under the outer jit) ---
    # Gather neighbor features; index in_pn selects the zero pad row, so masked
    # neighbor slots contribute exactly 0 (no mask stream needed).
    in_pc_pad = jnp.concatenate(
        [in_pc, jnp.zeros((B, 1, in_ch), in_pc.dtype)], axis=1)
    nb = jnp.take(in_pc_pad, neighbor_id, axis=1)          # (B, out_pn, max_nn, C)
    nb = jnp.transpose(nb, (0, 2, 1, 3))                   # (B, max_nn, out_pn, C)

    # Vertex coefficients, each repeated in_ch times along lanes; NOT batch-
    # duplicated — shared across the batch grid axis via its index_map.
    wwx = jnp.repeat(jnp.transpose(vcoeffs, (1, 0, 2)), in_ch, axis=2)  # (max_nn, out_pn, K)

    tile_p = _pick_tile_p(out_pn)
    grid = (B, out_pn // tile_p)

    kernel = functools.partial(lasm_layer_kernel,
                               apply_elu=not is_final_layer,
                               mxu_dtype=mxu_dtype)
    out = pl.pallas_call(
        kernel,
        out_shape=jax.ShapeDtypeStruct((B, out_pn, out_ch), jnp.float32),
        grid=grid,
        in_specs=[
            pl.BlockSpec((1, max_nn, tile_p, in_ch), lambda b, p: (b, 0, p, 0)),
            pl.BlockSpec((max_nn, tile_p, K),        lambda b, p: (0, p, 0)),
            pl.BlockSpec((K, out_ch),                lambda b, p: (0, 0)),
            pl.BlockSpec((tile_p, out_ch),           lambda b, p: (p, 0)),
        ],
        out_specs=pl.BlockSpec((1, tile_p, out_ch), lambda b, p: (b, p, 0)),
        compiler_params=pltpu.CompilerParams(
            dimension_semantics=("parallel", "parallel"),
            vmem_limit_bytes=32 * 1024 * 1024),
    )(nb, wwx, wmat_stacked.astype(mxu_dtype), bias)
    return out


@functools.partial(jax.jit, static_argnames=("mxu_dtype",))
def mc_fixed_enc_forward(in_pc, vcoeffs_list, layer_params, mxu_dtype=jnp.float32):
    """MCFixedEnc.forward: ELU on all but the last layer. Whole stack under one jit."""
    out = in_pc
    L = len(layer_params)
    for l, p in enumerate(layer_params):
        out = lasm_layer(out, vcoeffs_list[l], p["neighbor_id"], p["wmat"],
                         p["bias"], is_final_layer=(l == L - 1),
                         mxu_dtype=mxu_dtype)
    return out


# -------------------------- pure-JAX reference -------------------------------

def lasm_layer_ref(in_pc, raw_w_weights, neighbor_id, weights, bias, is_final_layer):
    B, in_pn, in_ch = in_pc.shape
    out_pn, max_nn = neighbor_id.shape
    weight_num = weights.shape[0]
    out_ch = bias.shape[1]
    pad = jnp.concatenate([in_pc, jnp.zeros((B, 1, in_ch), in_pc.dtype)], axis=1)
    mask = (neighbor_id != in_pn).astype(jnp.float32)
    ww = raw_w_weights * mask[:, :, None]
    nbv = jnp.take(pad, neighbor_id, axis=1)
    fuse = jnp.einsum("pnm,bpni->bpmi", ww, nbv)
    W = weights.reshape(weight_num, out_ch, in_ch)
    outn = jnp.einsum("moi,bpmi->bpmo", W, fuse)
    out = outn.sum(2) + bias
    if not is_final_layer:
        out = jnp.where(out > 0, out, jnp.exp(jnp.minimum(out, 0.0)) - 1.0)
    return out


def mc_fixed_enc_ref(in_pc, vcoeffs_list, layer_params):
    out = in_pc
    L = len(layer_params)
    for l, p in enumerate(layer_params):
        out = lasm_layer_ref(out, vcoeffs_list[l], p["neighbor_id"], p["weights"],
                             p["bias"], is_final_layer=(l == L - 1))
    return out


# --------------------------- parameter building ------------------------------

def build_params(key, channel_lst, ptnum_list, weight_num, max_nn):
    """Deterministic synthetic "structure" + parameters, in kernel-ready layout.

    Constant reshapes (stacked weight matrix) are hoisted here, done once.
    """
    layer_params = []
    vcoeffs_list = []
    L = len(channel_lst) - 1
    for l in range(L):
        in_ch, out_ch = channel_lst[l], channel_lst[l + 1]
        in_pn, out_pn = ptnum_list[l], ptnum_list[l + 1]
        # connection_info: point p connects to (2p + k) % in_pn for k < nn(p);
        # remaining slots hold the "missing" index in_pn (maps to the zero pad row).
        nid = np.full((out_pn, max_nn), in_pn, dtype=np.int32)
        for p in range(out_pn):
            nn_p = 3 + (p % (max_nn - 2))
            for k in range(nn_p):
                nid[p, k] = (2 * p + k) % in_pn
        key, k1, k2, k3 = jax.random.split(key, 4)
        weights = jax.random.normal(k1, (weight_num, out_ch * in_ch), jnp.float32)
        # Stacked layout for the single big-K matmul: wmat[(m,i), o] = W[m, o, i].
        wmat = jnp.transpose(weights.reshape(weight_num, out_ch, in_ch),
                             (0, 2, 1)).reshape(weight_num * in_ch, out_ch)
        bias = 0.1 * jax.random.normal(k3, (out_pn, out_ch), jnp.float32)  # per-point bias
        vco = jax.random.normal(k2, (out_pn, max_nn, weight_num), jnp.float32) / max_nn
        layer_params.append(dict(neighbor_id=jnp.asarray(nid),
                                 weights=weights, wmat=wmat, bias=bias))
        vcoeffs_list.append(vco)
    return layer_params, vcoeffs_list


# --------------------------------- main ---------------------------------------

if __name__ == "__main__":
    channel_lst = [4, 8, 16]      # in/out channels per layer (layer_num = 2)
    ptnum_list = [16, 8, 4]       # points per level
    weight_num = 4
    max_nn = 6
    batch = 2

    key = jax.random.PRNGKey(0)
    kp, kx = jax.random.split(key)
    layer_params, vcoeffs_list = build_params(kp, channel_lst, ptnum_list,
                                              weight_num, max_nn)
    in_pc = jax.random.normal(kx, (batch, ptnum_list[0], channel_lst[0]), jnp.float32)

    ref = np.asarray(mc_fixed_enc_ref(in_pc, vcoeffs_list, layer_params))

    # f32 MXU path: must match the reference tightly.
    out_f32 = jax.block_until_ready(
        mc_fixed_enc_forward(in_pc, vcoeffs_list, layer_params,
                             mxu_dtype=jnp.float32))
    np.testing.assert_allclose(np.asarray(out_f32), ref, rtol=1e-4, atol=1e-4)

    # bf16 MXU-operand path (f32 accumulation): loose sanity check only.
    out_bf16 = jax.block_until_ready(
        mc_fixed_enc_forward(in_pc, vcoeffs_list, layer_params,
                             mxu_dtype=jnp.bfloat16))
    rel = (np.max(np.abs(np.asarray(out_bf16) - ref))
           / (np.max(np.abs(ref)) + 1e-6))
    assert np.isfinite(rel) and rel < 5e-2, f"bf16 MXU path diverged: rel={rel}"

    print("KERNEL_OK")
</pallas_src>

<mosaic_0001>
module attributes {stable_mosaic.version = 11 : i64} {
  func.func @lasm_layer_kernel(%arg0: i32, %arg1: i32, %arg2: memref<1x6x8x4xf32, #tpu.memory_space<vmem>>, %arg3: memref<6x8x16xf32, #tpu.memory_space<vmem>>, %arg4: memref<16x8xf32, #tpu.memory_space<vmem>>, %arg5: memref<8x8xf32, #tpu.memory_space<vmem>>, %arg6: memref<1x8x8xf32, #tpu.memory_space<vmem>>) attributes {dimension_semantics = [#tpu.dimension_semantics<parallel>, #tpu.dimension_semantics<parallel>], iteration_bounds = array<i64: 2, 1>, scalar_prefetch = 0 : i64, scratch_operands = 0 : i64, tpu.core_type = #tpu.core_type<tc>, window_params = [{transform_indices = @transform_0, window_bounds = array<i64: 1, 6, 8, 4>}, {transform_indices = @transform_1, window_bounds = array<i64: 6, 8, 16>}, {pipeline_mode = #tpu.pipeline_mode<synchronous>, transform_indices = @transform_2, window_bounds = array<i64: 16, 8>}, {transform_indices = @transform_3, window_bounds = array<i64: 8, 8>}, {transform_indices = @transform_4, window_bounds = array<i64: 1, 8, 8>}]} {
    %0 = tpu.iota {dimensions = array<i32: 1>} : vector<4x16xi32>
    %1 = tpu.iota {dimensions = array<i32: 0>} : vector<4x16xi32>
    %c4_i32 = arith.constant 4 : i32
    %c0_i32 = arith.constant 0 : i32
    %2 = arith.cmpi eq, %c4_i32, %c0_i32 : i32
    %c1_i32 = arith.constant 1 : i32
    %3 = arith.select %2, %c1_i32, %c4_i32 : i32
    %4 = vector.broadcast %3 : i32 to vector<4x16xi32>
    %5 = arith.remsi %0, %4 : vector<4x16xi32>
    %c0_i32_0 = arith.constant 0 : i32
    %6 = vector.broadcast %c0_i32_0 : i32 to vector<4x16xi32>
    %7 = arith.cmpi ne, %5, %6 : vector<4x16xi32>
    %c0_i32_1 = arith.constant 0 : i32
    %8 = vector.broadcast %c0_i32_1 : i32 to vector<4x16xi32>
    %9 = arith.cmpi slt, %5, %8 : vector<4x16xi32>
    %c0_i32_2 = arith.constant 0 : i32
    %10 = arith.cmpi slt, %3, %c0_i32_2 : i32
    %11 = vector.broadcast %10 : i1 to vector<4x16xi1>
    %12 = vector.broadcast %11 : vector<4x16xi1> to vector<4x16xi1>
    %13 = arith.xori %9, %12 : vector<4x16xi1>
    %14 = arith.andi %13, %7 : vector<4x16xi1>
    %15 = vector.broadcast %3 : i32 to vector<4x16xi32>
    %16 = arith.addi %5, %15 : vector<4x16xi32>
    %17 = arith.select %14, %16, %5 : vector<4x16xi1>, vector<4x16xi32>
    %18 = arith.cmpi eq, %17, %1 : vector<4x16xi32>
    %19 = arith.extui %18 : vector<4x16xi1> to vector<4x16xi32>
    %20 = arith.sitofp %19 : vector<4x16xi32> to vector<4x16xf32>
    %cst = arith.constant 0.000000e+00 : f32
    %21 = vector.broadcast %cst : f32 to vector<8x16xf32>
    %c0 = arith.constant 0 : index
    %c0_3 = arith.constant 0 : index
    %c0_4 = arith.constant 0 : index
    %c0_5 = arith.constant 0 : index
    %22 = vector.load %arg2[%c0, %c0_3, %c0_4, %c0_5] : memref<1x6x8x4xf32, #tpu.memory_space<vmem>>, vector<1x1x8x4xf32>
    %23 = vector.shape_cast %22 : vector<1x1x8x4xf32> to vector<8x4xf32>
    %cst_6 = arith.constant dense<0.000000e+00> : vector<8x16xf32>
    %24 = tpu.matmul %23, %20, %cst_6 {dimension_numbers = #tpu.dot_dimension_numbers<[1], [0], [0], [1], [0, 0, 1, 1], [], []>} : vector<8x4xf32>, vector<4x16xf32>, vector<8x16xf32> -> vector<8x16xf32>
    %c0_7 = arith.constant 0 : index
    %c0_8 = arith.constant 0 : index
    %c0_9 = arith.constant 0 : index
    %25 = vector.load %arg3[%c0_7, %c0_8, %c0_9] : memref<6x8x16xf32, #tpu.memory_space<vmem>>, vector<1x8x16xf32>
    %26 = vector.shape_cast %25 : vector<1x8x16xf32> to vector<8x16xf32>
    %27 = arith.mulf %26, %24 : vector<8x16xf32>
    %28 = arith.addf %21, %27 : vector<8x16xf32>
    %c0_10 = arith.constant 0 : index
    %c1 = arith.constant 1 : index
    %c0_11 = arith.constant 0 : index
    %c0_12 = arith.constant 0 : index
    %29 = vector.load %arg2[%c0_10, %c1, %c0_11, %c0_12] : memref<1x6x8x4xf32, #tpu.memory_space<vmem>>, vector<1x1x8x4xf32>
    %30 = vector.shape_cast %29 : vector<1x1x8x4xf32> to vector<8x4xf32>
    %cst_13 = arith.constant dense<0.000000e+00> : vector<8x16xf32>
    %31 = tpu.matmul %30, %20, %cst_13 {dimension_numbers = #tpu.dot_dimension_numbers<[1], [0], [0], [1], [0, 0, 1, 1], [], []>} : vector<8x4xf32>, vector<4x16xf32>, vector<8x16xf32> -> vector<8x16xf32>
    %c1_14 = arith.constant 1 : index
    %c0_15 = arith.constant 0 : index
    %c0_16 = arith.constant 0 : index
    %32 = vector.load %arg3[%c1_14, %c0_15, %c0_16] : memref<6x8x16xf32, #tpu.memory_space<vmem>>, vector<1x8x16xf32>
    %33 = vector.shape_cast %32 : vector<1x8x16xf32> to vector<8x16xf32>
    %34 = arith.mulf %33, %31 : vector<8x16xf32>
    %35 = arith.addf %28, %34 : vector<8x16xf32>
    %c0_17 = arith.constant 0 : index
    %c2 = arith.constant 2 : index
    %c0_18 = arith.constant 0 : index
    %c0_19 = arith.constant 0 : index
    %36 = vector.load %arg2[%c0_17, %c2, %c0_18, %c0_19] : memref<1x6x8x4xf32, #tpu.memory_space<vmem>>, vector<1x1x8x4xf32>
    %37 = vector.shape_cast %36 : vector<1x1x8x4xf32> to vector<8x4xf32>
    %cst_20 = arith.constant dense<0.000000e+00> : vector<8x16xf32>
    %38 = tpu.matmul %37, %20, %cst_20 {dimension_numbers = #tpu.dot_dimension_numbers<[1], [0], [0], [1], [0, 0, 1, 1], [], []>} : vector<8x4xf32>, vector<4x16xf32>, vector<8x16xf32> -> vector<8x16xf32>
    %c2_21 = arith.constant 2 : index
    %c0_22 = arith.constant 0 : index
    %c0_23 = arith.constant 0 : index
    %39 = vector.load %arg3[%c2_21, %c0_22, %c0_23] : memref<6x8x16xf32, #tpu.memory_space<vmem>>, vector<1x8x16xf32>
    %40 = vector.shape_cast %39 : vector<1x8x16xf32> to vector<8x16xf32>
    %41 = arith.mulf %40, %38 : vector<8x16xf32>
    %42 = arith.addf %35, %41 : vector<8x16xf32>
    %c0_24 = arith.constant 0 : index
    %c3 = arith.constant 3 : index
    %c0_25 = arith.constant 0 : index
    %c0_26 = arith.constant 0 : index
    %43 = vector.load %arg2[%c0_24, %c3, %c0_25, %c0_26] : memref<1x6x8x4xf32, #tpu.memory_space<vmem>>, vector<1x1x8x4xf32>
    %44 = vector.shape_cast %43 : vector<1x1x8x4xf32> to vector<8x4xf32>
    %cst_27 = arith.constant dense<0.000000e+00> : vector<8x16xf32>
    %45 = tpu.matmul %44, %20, %cst_27 {dimension_numbers = #tpu.dot_dimension_numbers<[1], [0], [0], [1], [0, 0, 1, 1], [], []>} : vector<8x4xf32>, vector<4x16xf32>, vector<8x16xf32> -> vector<8x16xf32>
    %c3_28 = arith.constant 3 : index
    %c0_29 = arith.constant 0 : index
    %c0_30 = arith.constant 0 : index
    %46 = vector.load %arg3[%c3_28, %c0_29, %c0_30] : memref<6x8x16xf32, #tpu.memory_space<vmem>>, vector<1x8x16xf32>
    %47 = vector.shape_cast %46 : vector<1x8x16xf32> to vector<8x16xf32>
    %48 = arith.mulf %47, %45 : vector<8x16xf32>
    %49 = arith.addf %42, %48 : vector<8x16xf32>
    %c0_31 = arith.constant 0 : index
    %c4 = arith.constant 4 : index
    %c0_32 = arith.constant 0 : index
    %c0_33 = arith.constant 0 : index
    %50 = vector.load %arg2[%c0_31, %c4, %c0_32, %c0_33] : memref<1x6x8x4xf32, #tpu.memory_space<vmem>>, vector<1x1x8x4xf32>
    %51 = vector.shape_cast %50 : vector<1x1x8x4xf32> to vector<8x4xf32>
    %cst_34 = arith.constant dense<0.000000e+00> : vector<8x16xf32>
    %52 = tpu.matmul %51, %20, %cst_34 {dimension_numbers = #tpu.dot_dimension_numbers<[1], [0], [0], [1], [0, 0, 1, 1], [], []>} : vector<8x4xf32>, vector<4x16xf32>, vector<8x16xf32> -> vector<8x16xf32>
    %c4_35 = arith.constant 4 : index
    %c0_36 = arith.constant 0 : index
    %c0_37 = arith.constant 0 : index
    %53 = vector.load %arg3[%c4_35, %c0_36, %c0_37] : memref<6x8x16xf32, #tpu.memory_space<vmem>>, vector<1x8x16xf32>
    %54 = vector.shape_cast %53 : vector<1x8x16xf32> to vector<8x16xf32>
    %55 = arith.mulf %54, %52 : vector<8x16xf32>
    %56 = arith.addf %49, %55 : vector<8x16xf32>
    %c0_38 = arith.constant 0 : index
    %c5 = arith.constant 5 : index
    %c0_39 = arith.constant 0 : index
    %c0_40 = arith.constant 0 : index
    %57 = vector.load %arg2[%c0_38, %c5, %c0_39, %c0_40] : memref<1x6x8x4xf32, #tpu.memory_space<vmem>>, vector<1x1x8x4xf32>
    %58 = vector.shape_cast %57 : vector<1x1x8x4xf32> to vector<8x4xf32>
    %cst_41 = arith.constant dense<0.000000e+00> : vector<8x16xf32>
    %59 = tpu.matmul %58, %20, %cst_41 {dimension_numbers = #tpu.dot_dimension_numbers<[1], [0], [0], [1], [0, 0, 1, 1], [], []>} : vector<8x4xf32>, vector<4x16xf32>, vector<8x16xf32> -> vector<8x16xf32>
    %c5_42 = arith.constant 5 : index
    %c0_43 = arith.constant 0 : index
    %c0_44 = arith.constant 0 : index
    %60 = vector.load %arg3[%c5_42, %c0_43, %c0_44] : memref<6x8x16xf32, #tpu.memory_space<vmem>>, vector<1x8x16xf32>
    %61 = vector.shape_cast %60 : vector<1x8x16xf32> to vector<8x16xf32>
    %62 = arith.mulf %61, %59 : vector<8x16xf32>
    %63 = arith.addf %56, %62 : vector<8x16xf32>
    %c0_45 = arith.constant 0 : index
    %c0_46 = arith.constant 0 : index
    %64 = vector.load %arg4[%c0_45, %c0_46] : memref<16x8xf32, #tpu.memory_space<vmem>>, vector<16x8xf32>
    %cst_47 = arith.constant dense<0.000000e+00> : vector<8x8xf32>
    %65 = tpu.matmul %63, %64, %cst_47 {dimension_numbers = #tpu.dot_dimension_numbers<[1], [0], [0], [1], [0, 0, 1, 1], [], []>} : vector<8x16xf32>, vector<16x8xf32>, vector<8x8xf32> -> vector<8x8xf32>
    %c0_48 = arith.constant 0 : index
    %c0_49 = arith.constant 0 : index
    %66 = vector.load %arg5[%c0_48, %c0_49] : memref<8x8xf32, #tpu.memory_space<vmem>>, vector<8x8xf32>
    %67 = arith.addf %65, %66 : vector<8x8xf32>
    %cst_50 = arith.constant 0.000000e+00 : f32
    %68 = vector.broadcast %cst_50 : f32 to vector<8x8xf32>
    %69 = arith.cmpf ogt, %67, %68 : vector<8x8xf32>
    %cst_51 = arith.constant 0.000000e+00 : f32
    %70 = vector.broadcast %cst_51 : f32 to vector<8x8xf32>
    %71 = arith.minimumf %67, %70 : vector<8x8xf32>
    %72 = math.exp %71 : vector<8x8xf32>
    %cst_52 = arith.constant 1.000000e+00 : f32
    %73 = vector.broadcast %cst_52 : f32 to vector<8x8xf32>
    %74 = arith.subf %72, %73 : vector<8x8xf32>
    %75 = arith.select %69, %67, %74 : vector<8x8xi1>, vector<8x8xf32>
    %c0_53 = arith.constant 0 : index
    %c0_54 = arith.constant 0 : index
    %c0_55 = arith.constant 0 : index
    %76 = vector.load %arg6[%c0_53, %c0_54, %c0_55] : memref<1x8x8xf32, #tpu.memory_space<vmem>>, vector<1x8x8xf32>
    %77 = vector.shape_cast %76 : vector<1x8x8xf32> to vector<8x8xf32>
    %78 = vector.shape_cast %75 : vector<8x8xf32> to vector<1x8x8xf32>
    tpu.vector_store %arg6[%c0_53, %c0_54, %c0_55], %78 {strides = array<i32>} : memref<1x8x8xf32, #tpu.memory_space<vmem>>, vector<1x8x8xf32>,
    return
  }
  func.func @transform_0(%arg0: i32, %arg1: i32) -> (i32, i32, i32, i32) {
    %c0_i32 = arith.constant 0 : i32
    %c0_i32_0 = arith.constant 0 : i32
    %c0_i32_1 = arith.constant 0 : i32
    return %arg0, %c0_i32, %arg1, %c0_i32_0 : i32, i32, i32, i32
  }
  func.func @transform_1(%arg0: i32, %arg1: i32) -> (i32, i32, i32) {
    %c0_i32 = arith.constant 0 : i32
    %c0_i32_0 = arith.constant 0 : i32
    %c0_i32_1 = arith.constant 0 : i32
    return %c0_i32, %arg1, %c0_i32_0 : i32, i32, i32
  }
  func.func @transform_2(%arg0: i32, %arg1: i32) -> (i32, i32) {
    %c0_i32 = arith.constant 0 : i32
    %c0_i32_0 = arith.constant 0 : i32
    %c0_i32_1 = arith.constant 0 : i32
    return %c0_i32, %c0_i32_0 : i32, i32
  }
  func.func @transform_3(%arg0: i32, %arg1: i32) -> (i32, i32) {
    %c0_i32 = arith.constant 0 : i32
    %c0_i32_0 = arith.constant 0 : i32
    return %arg1, %c0_i32 : i32, i32
  }
  func.func @transform_4(%arg0: i32, %arg1: i32) -> (i32, i32, i32) {
    %c0_i32 = arith.constant 0 : i32
    %c0_i32_0 = arith.constant 0 : i32
    return %arg0, %arg1, %c0_i32 : i32, i32, i32
  }
}

module attributes {stable_mosaic.version = 11 : i64} {
  func.func @lasm_layer_kernel(%arg0: i32, %arg1: i32, %arg2: memref<1x6x4x8xf32, #tpu.memory_space<vmem>>, %arg3: memref<6x4x32xf32, #tpu.memory_space<vmem>>, %arg4: memref<32x16xf32, #tpu.memory_space<vmem>>, %arg5: memref<4x16xf32, #tpu.memory_space<vmem>>, %arg6: memref<1x4x16xf32, #tpu.memory_space<vmem>>) attributes {dimension_semantics = [#tpu.dimension_semantics<parallel>, #tpu.dimension_semantics<parallel>], iteration_bounds = array<i64: 2, 1>, scalar_prefetch = 0 : i64, scratch_operands = 0 : i64, tpu.core_type = #tpu.core_type<tc>, window_params = [{transform_indices = @transform_0, window_bounds = array<i64: 1, 6, 4, 8>}, {transform_indices = @transform_1, window_bounds = array<i64: 6, 4, 32>}, {pipeline_mode = #tpu.pipeline_mode<synchronous>, transform_indices = @transform_2, window_bounds = array<i64: 32, 16>}, {transform_indices = @transform_3, window_bounds = array<i64: 4, 16>}, {transform_indices = @transform_4, window_bounds = array<i64: 1, 4, 16>}]} {
    %0 = tpu.iota {dimensions = array<i32: 1>} : vector<8x32xi32>
    %1 = tpu.iota {dimensions = array<i32: 0>} : vector<8x32xi32>
    %c8_i32 = arith.constant 8 : i32
    %c0_i32 = arith.constant 0 : i32
    %2 = arith.cmpi eq, %c8_i32, %c0_i32 : i32
    %c1_i32 = arith.constant 1 : i32
    %3 = arith.select %2, %c1_i32, %c8_i32 : i32
    %4 = vector.broadcast %3 : i32 to vector<8x32xi32>
    %5 = arith.remsi %0, %4 : vector<8x32xi32>
    %c0_i32_0 = arith.constant 0 : i32
    %6 = vector.broadcast %c0_i32_0 : i32 to vector<8x32xi32>
    %7 = arith.cmpi ne, %5, %6 : vector<8x32xi32>
    %c0_i32_1 = arith.constant 0 : i32
    %8 = vector.broadcast %c0_i32_1 : i32 to vector<8x32xi32>
    %9 = arith.cmpi slt, %5, %8 : vector<8x32xi32>
    %c0_i32_2 = arith.constant 0 : i32
    %10 = arith.cmpi slt, %3, %c0_i32_2 : i32
    %11 = vector.broadcast %10 : i1 to vector<8x32xi1>
    %12 = vector.broadcast %11 : vector<8x32xi1> to vector<8x32xi1>
    %13 = arith.xori %9, %12 : vector<8x32xi1>
    %14 = arith.andi %13, %7 : vector<8x32xi1>
    %15 = vector.broadcast %3 : i32 to vector<8x32xi32>
    %16 = arith.addi %5, %15 : vector<8x32xi32>
    %17 = arith.select %14, %16, %5 : vector<8x32xi1>, vector<8x32xi32>
    %18 = arith.cmpi eq, %17, %1 : vector<8x32xi32>
    %19 = arith.extui %18 : vector<8x32xi1> to vector<8x32xi32>
    %20 = arith.sitofp %19 : vector<8x32xi32> to vector<8x32xf32>
    %cst = arith.constant 0.000000e+00 : f32
    %21 = vector.broadcast %cst : f32 to vector<4x32xf32>
    %c0 = arith.constant 0 : index
    %c0_3 = arith.constant 0 : index
    %c0_4 = arith.constant 0 : index
    %c0_5 = arith.constant 0 : index
    %22 = vector.load %arg2[%c0, %c0_3, %c0_4, %c0_5] : memref<1x6x4x8xf32, #tpu.memory_space<vmem>>, vector<1x1x4x8xf32>
    %23 = vector.shape_cast %22 : vector<1x1x4x8xf32> to vector<4x8xf32>
    %cst_6 = arith.constant dense<0.000000e+00> : vector<4x32xf32>
    %24 = tpu.matmul %23, %20, %cst_6 {dimension_numbers = #tpu.dot_dimension_numbers<[1], [0], [0], [1], [0, 0, 1, 1], [], []>} : vector<4x8xf32>, vector<8x32xf32>, vector<4x32xf32> -> vector<4x32xf32>
    %c0_7 = arith.constant 0 : index
    %c0_8 = arith.constant 0 : index
    %c0_9 = arith.constant 0 : index
    %25 = vector.load %arg3[%c0_7, %c0_8, %c0_9] : memref<6x4x32xf32, #tpu.memory_space<vmem>>, vector<1x4x32xf32>
    %26 = vector.shape_cast %25 : vector<1x4x32xf32> to vector<4x32xf32>
    %27 = arith.mulf %26, %24 : vector<4x32xf32>
    %28 = arith.addf %21, %27 : vector<4x32xf32>
    %c0_10 = arith.constant 0 : index
    %c1 = arith.constant 1 : index
    %c0_11 = arith.constant 0 : index
    %c0_12 = arith.constant 0 : index
    %29 = vector.load %arg2[%c0_10, %c1, %c0_11, %c0_12] : memref<1x6x4x8xf32, #tpu.memory_space<vmem>>, vector<1x1x4x8xf32>
    %30 = vector.shape_cast %29 : vector<1x1x4x8xf32> to vector<4x8xf32>
    %cst_13 = arith.constant dense<0.000000e+00> : vector<4x32xf32>
    %31 = tpu.matmul %30, %20, %cst_13 {dimension_numbers = #tpu.dot_dimension_numbers<[1], [0], [0], [1], [0, 0, 1, 1], [], []>} : vector<4x8xf32>, vector<8x32xf32>, vector<4x32xf32> -> vector<4x32xf32>
    %c1_14 = arith.constant 1 : index
    %c0_15 = arith.constant 0 : index
    %c0_16 = arith.constant 0 : index
    %32 = vector.load %arg3[%c1_14, %c0_15, %c0_16] : memref<6x4x32xf32, #tpu.memory_space<vmem>>, vector<1x4x32xf32>
    %33 = vector.shape_cast %32 : vector<1x4x32xf32> to vector<4x32xf32>
    %34 = arith.mulf %33, %31 : vector<4x32xf32>
    %35 = arith.addf %28, %34 : vector<4x32xf32>
    %c0_17 = arith.constant 0 : index
    %c2 = arith.constant 2 : index
    %c0_18 = arith.constant 0 : index
    %c0_19 = arith.constant 0 : index
    %36 = vector.load %arg2[%c0_17, %c2, %c0_18, %c0_19] : memref<1x6x4x8xf32, #tpu.memory_space<vmem>>, vector<1x1x4x8xf32>
    %37 = vector.shape_cast %36 : vector<1x1x4x8xf32> to vector<4x8xf32>
    %cst_20 = arith.constant dense<0.000000e+00> : vector<4x32xf32>
    %38 = tpu.matmul %37, %20, %cst_20 {dimension_numbers = #tpu.dot_dimension_numbers<[1], [0], [0], [1], [0, 0, 1, 1], [], []>} : vector<4x8xf32>, vector<8x32xf32>, vector<4x32xf32> -> vector<4x32xf32>
    %c2_21 = arith.constant 2 : index
    %c0_22 = arith.constant 0 : index
    %c0_23 = arith.constant 0 : index
    %39 = vector.load %arg3[%c2_21, %c0_22, %c0_23] : memref<6x4x32xf32, #tpu.memory_space<vmem>>, vector<1x4x32xf32>
    %40 = vector.shape_cast %39 : vector<1x4x32xf32> to vector<4x32xf32>
    %41 = arith.mulf %40, %38 : vector<4x32xf32>
    %42 = arith.addf %35, %41 : vector<4x32xf32>
    %c0_24 = arith.constant 0 : index
    %c3 = arith.constant 3 : index
    %c0_25 = arith.constant 0 : index
    %c0_26 = arith.constant 0 : index
    %43 = vector.load %arg2[%c0_24, %c3, %c0_25, %c0_26] : memref<1x6x4x8xf32, #tpu.memory_space<vmem>>, vector<1x1x4x8xf32>
    %44 = vector.shape_cast %43 : vector<1x1x4x8xf32> to vector<4x8xf32>
    %cst_27 = arith.constant dense<0.000000e+00> : vector<4x32xf32>
    %45 = tpu.matmul %44, %20, %cst_27 {dimension_numbers = #tpu.dot_dimension_numbers<[1], [0], [0], [1], [0, 0, 1, 1], [], []>} : vector<4x8xf32>, vector<8x32xf32>, vector<4x32xf32> -> vector<4x32xf32>
    %c3_28 = arith.constant 3 : index
    %c0_29 = arith.constant 0 : index
    %c0_30 = arith.constant 0 : index
    %46 = vector.load %arg3[%c3_28, %c0_29, %c0_30] : memref<6x4x32xf32, #tpu.memory_space<vmem>>, vector<1x4x32xf32>
    %47 = vector.shape_cast %46 : vector<1x4x32xf32> to vector<4x32xf32>
    %48 = arith.mulf %47, %45 : vector<4x32xf32>
    %49 = arith.addf %42, %48 : vector<4x32xf32>
    %c0_31 = arith.constant 0 : index
    %c4 = arith.constant 4 : index
    %c0_32 = arith.constant 0 : index
    %c0_33 = arith.constant 0 : index
    %50 = vector.load %arg2[%c0_31, %c4, %c0_32, %c0_33] : memref<1x6x4x8xf32, #tpu.memory_space<vmem>>, vector<1x1x4x8xf32>
    %51 = vector.shape_cast %50 : vector<1x1x4x8xf32> to vector<4x8xf32>
    %cst_34 = arith.constant dense<0.000000e+00> : vector<4x32xf32>
    %52 = tpu.matmul %51, %20, %cst_34 {dimension_numbers = #tpu.dot_dimension_numbers<[1], [0], [0], [1], [0, 0, 1, 1], [], []>} : vector<4x8xf32>, vector<8x32xf32>, vector<4x32xf32> -> vector<4x32xf32>
    %c4_35 = arith.constant 4 : index
    %c0_36 = arith.constant 0 : index
    %c0_37 = arith.constant 0 : index
    %53 = vector.load %arg3[%c4_35, %c0_36, %c0_37] : memref<6x4x32xf32, #tpu.memory_space<vmem>>, vector<1x4x32xf32>
    %54 = vector.shape_cast %53 : vector<1x4x32xf32> to vector<4x32xf32>
    %55 = arith.mulf %54, %52 : vector<4x32xf32>
    %56 = arith.addf %49, %55 : vector<4x32xf32>
    %c0_38 = arith.constant 0 : index
    %c5 = arith.constant 5 : index
    %c0_39 = arith.constant 0 : index
    %c0_40 = arith.constant 0 : index
    %57 = vector.load %arg2[%c0_38, %c5, %c0_39, %c0_40] : memref<1x6x4x8xf32, #tpu.memory_space<vmem>>, vector<1x1x4x8xf32>
    %58 = vector.shape_cast %57 : vector<1x1x4x8xf32> to vector<4x8xf32>
    %cst_41 = arith.constant dense<0.000000e+00> : vector<4x32xf32>
    %59 = tpu.matmul %58, %20, %cst_41 {dimension_numbers = #tpu.dot_dimension_numbers<[1], [0], [0], [1], [0, 0, 1, 1], [], []>} : vector<4x8xf32>, vector<8x32xf32>, vector<4x32xf32> -> vector<4x32xf32>
    %c5_42 = arith.constant 5 : index
    %c0_43 = arith.constant 0 : index
    %c0_44 = arith.constant 0 : index
    %60 = vector.load %arg3[%c5_42, %c0_43, %c0_44] : memref<6x4x32xf32, #tpu.memory_space<vmem>>, vector<1x4x32xf32>
    %61 = vector.shape_cast %60 : vector<1x4x32xf32> to vector<4x32xf32>
    %62 = arith.mulf %61, %59 : vector<4x32xf32>
    %63 = arith.addf %56, %62 : vector<4x32xf32>
    %c0_45 = arith.constant 0 : index
    %c0_46 = arith.constant 0 : index
    %64 = vector.load %arg4[%c0_45, %c0_46] : memref<32x16xf32, #tpu.memory_space<vmem>>, vector<32x16xf32>
    %cst_47 = arith.constant dense<0.000000e+00> : vector<4x16xf32>
    %65 = tpu.matmul %63, %64, %cst_47 {dimension_numbers = #tpu.dot_dimension_numbers<[1], [0], [0], [1], [0, 0, 1, 1], [], []>} : vector<4x32xf32>, vector<32x16xf32>, vector<4x16xf32> -> vector<4x16xf32>
    %c0_48 = arith.constant 0 : index
    %c0_49 = arith.constant 0 : index
    %66 = vector.load %arg5[%c0_48, %c0_49] : memref<4x16xf32, #tpu.memory_space<vmem>>, vector<4x16xf32>
    %67 = arith.addf %65, %66 : vector<4x16xf32>
    %c0_50 = arith.constant 0 : index
    %c0_51 = arith.constant 0 : index
    %c0_52 = arith.constant 0 : index
    %68 = vector.load %arg6[%c0_50, %c0_51, %c0_52] : memref<1x4x16xf32, #tpu.memory_space<vmem>>, vector<1x4x16xf32>
    %69 = vector.shape_cast %68 : vector<1x4x16xf32> to vector<4x16xf32>
    %70 = vector.shape_cast %67 : vector<4x16xf32> to vector<1x4x16xf32>
    tpu.vector_store %arg6[%c0_50, %c0_51, %c0_52], %70 {strides = array<i32>} : memref<1x4x16xf32, #tpu.memory_space<vmem>>, vector<1x4x16xf32>,
    return
  }
  func.func @transform_0(%arg0: i32, %arg1: i32) -> (i32, i32, i32, i32) {
    %c0_i32 = arith.constant 0 : i32
    %c0_i32_0 = arith.constant 0 : i32
    %c0_i32_1 = arith.constant 0 : i32
    return %arg0, %c0_i32, %arg1, %c0_i32_0 : i32, i32, i32, i32
  }
  func.func @transform_1(%arg0: i32, %arg1: i32) -> (i32, i32, i32) {
    %c0_i32 = arith.constant 0 : i32
    %c0_i32_0 = arith.constant 0 : i32
    %c0_i32_1 = arith.constant 0 : i32
    return %c0_i32, %arg1, %c0_i32_0 : i32, i32, i32
  }
  func.func @transform_2(%arg0: i32, %arg1: i32) -> (i32, i32) {
    %c0_i32 = arith.constant 0 : i32
    %c0_i32_0 = arith.constant 0 : i32
    %c0_i32_1 = arith.constant 0 : i32
    return %c0_i32, %c0_i32_0 : i32, i32
  }
  func.func @transform_3(%arg0: i32, %arg1: i32) -> (i32, i32) {
    %c0_i32 = arith.constant 0 : i32
    %c0_i32_0 = arith.constant 0 : i32
    return %arg1, %c0_i32 : i32, i32
  }
  func.func @transform_4(%arg0: i32, %arg1: i32) -> (i32, i32, i32) {
    %c0_i32 = arith.constant 0 : i32
    %c0_i32_0 = arith.constant 0 : i32
    return %arg0, %arg1, %c0_i32 : i32, i32, i32
  }
}

</mosaic_0001>

<bundles_post_ra>
// kernel: mc_fixed_enc_forward.2
= control target key start
LH: loop header
LB: loop body
LE: loop exit
PB: predicated region body
PF: predicated region fallthrough
CT: control target
= control target key end

     0   :  { %s1118_s15 = smov 0   ;;  %s1120_s16 = smov 0   ;;  %s1201_s0 = inlined_call_operand.vmem [shape: f32[2,6,8,4], index: 0, kind: input, shape index: {}]   ;;  %s1202_s1 = inlined_call_operand.vmem [shape: f32[6,8,16], index: 1, kind: input, shape index: {}]   ;;  %s1203_s2 = inlined_call_operand.vmem [shape: f32[16,8], index: 2, kind: input, shape index: {}]   ;;  %s1204_s3 = inlined_call_operand.vmem [shape: f32[8,8], index: 3, kind: input, shape index: {}]   ;;  %s1205_s4 = inlined_call_operand.vmem [shape: f32[2,8,8], index: 4, kind: output, shape index: {}]  }
   0x1   :  { %s1122_s17 = smov 0  }
   0x2 LB: > { %s26_s18 = sadd.s32 1, %s1085_s16  ;;  %p956_p0 = scmp.ge.s32.totalorder %s1089_s17, 1  ;;  %s1089_s17 = sphi %s1122_s17, %s14_s17   ;;  %s1085_s16 = sphi %s1120_s16, %s1207_s16   ;;  %s1081_s15 = sphi %s1118_s15, %s1206_s15  }
   0x3   : > { %p28_p1 = scmp.ge.s32.totalorder %s26_s18, 2  ;;  %p199_p2 = scmp.lt.s32.totalorder %s1089_s17, 3 }
   0x5   : > { %s1209_s18 = smov (%p28_p1, %s26_s18), 0  ;;  %p200_p3 = pnand %p956_p0, %p199_p2 }
   0x6   : > { %p238_p4 = scmp.lt.s32.totalorder (!%p200_p3), %s1081_s15, 1 }
   0x7   : > { %203 = sbr.rel (%p200_p3) target bundleno = 445 (0x1bd), region = 36 }
   0xc   : > { %v261_v0 = vlaneseq  ;;  %v1091_v1 = vmov 0.0   ;;  %vm1092_vm0 = vmmov 0   ;;  %s1211_s15 = smov (!%p238_p4, %s1081_s15), 1  ;;  %vm285_vm1 = vcmask 1043456   ;;  %v758_v12 = vld [vmem:[%s1203_s2 + $0x8] sm:$0xff]  ;;  %v757_v13 = vld [vmem:[%s1203_s2] sm:$0xff] }
   0xd   : > { %1001 = vmatprep.subr.mxu0 %v1091_v1  ;;  %1003 = vmatprep.mubr.msk.f32.mxu0 %vm1092_vm0, %v1091_v1  ;;  %s1038_s19 = smul.u32 48, %s1211_s15  ;;  %vm281_vm3 = vcmask 31744   ;;  %v359_v14 = vld [vmem:[%s1202_s1] sm:$0xff]  ;;  %v965_v15 = vld [vmem:[%s1202_s1 + $0x8] sm:$0xff]  ;;  %v969_v21 = vld [vmem:[%s1202_s1 + $0x10] sm:$0xff]  ;;  %vm760_vm4 = vcmask 130048  }
   0xe   : > { %v262_v2 = vand.u32 127, %v261_v0  ;;  %v264_v3 = vshrl.u32 %v261_v0, 7  ;;  %1006 = vmatprep.subr.mxu1 %v1091_v1  ;;  %1008 = vmatprep.mubr.msk.f32.mxu1 %vm1092_vm0, %v1091_v1  ;;  %v973_v23 = vld [vmem:[%s1202_s1 + $0x18] sm:$0xff]  ;;  %v977_v30 = vld [vmem:[%s1202_s1 + $0x20] sm:$0xff]  ;;  %v981_v33 = vld [vmem:[%s1202_s1 + $0x28] sm:$0xff]  ;;  %vm840_vm5 = vcmask 64512  }
   0xf   : > { %s245_s22 = scalar_lea.vmem %s1201_s0, %s1038_s19  ;;  %v759_v43 = vld [vmem:[%s1204_s3] sm:$0xff]  ;;  %s958_s19 = sshll.u32 %s1211_s15, 3 }
  0x10   : > { %v269_v4 = vand.u32 3, %v262_v2  ;;  %v280_v6 = vld [vmem:[%s245_s22] sm:$0xff]  ;;  %v962_v7 = vld [vmem:[%s245_s22 + $0x8] sm:$0xff]  ;;  %v966_v8 = vld [vmem:[%s245_s22 + $0x10] sm:$0xff] }
  0x11   : > { %v970_v9 = vld [vmem:[%s245_s22 + $0x18] sm:$0xff]  ;;  %v974_v10 = vld [vmem:[%s245_s22 + $0x20] sm:$0xff]  ;;  %v978_v11 = vld [vmem:[%s245_s22 + $0x28] sm:$0xff]  ;;  %s260_s22 = scalar_lea.vmem %s1205_s4, %s958_s19 }
  0x12   : > { %vm277_vm2 = vcmp.eq.s32.totalorder %v269_v4, %v264_v3 }
  0x13   : > { %v959_v5 = vsel %vm277_vm2, 1.0, %v1091_v1 }
  0x14   : > { %1002 = vmatpush3.msk.msra.mxu0 %vm285_vm1, %v959_v5  ;;  %1007 = vmatpush3.msk.msra.mxu1 %vm285_vm1, %v959_v5 }
  0x15   : > { %1004 = vmatmul.mubr.msk.f32.vlgmr.msra.gmra.mxu0 %vm281_vm3, %v280_v6  ;;  %1011 = vmatprep.subr.mxu0 %v1091_v1 }
  0x16   : > { %1009 = vmatmul.mubr.msk.f32.vlgmr.msra.gmra.mxu1 %vm281_vm3, %v962_v7  ;;  %1012 = vmatpush3.msk.msra.mxu0 %vm285_vm1, %v959_v5 }
  0x17   : > { %1016 = vmatprep.subr.mxu1 %v1091_v1  ;;  %1013 = vmatprep.mubr.msk.f32.mxu0 %vm1092_vm0, %v1091_v1 }
  0x18   : > { %1017 = vmatpush3.msk.msra.mxu1 %vm285_vm1, %v959_v5  ;;  %1018 = vmatprep.mubr.msk.f32.mxu1 %vm1092_vm0, %v1091_v1 }
  0x19   : > { %1014 = vmatmul.mubr.msk.f32.vlgmr.msra.gmra.mxu0 %vm281_vm3, %v966_v8  ;;  %1021 = vmatprep.subr.mxu0 %v1091_v1 }
  0x1a   : > { %1019 = vmatmul.mubr.msk.f32.vlgmr.msra.gmra.mxu1 %vm281_vm3, %v970_v9  ;;  %1022 = vmatpush3.msk.msra.mxu0 %vm285_vm1, %v959_v5 }
  0x1b   : > { %1026 = vmatprep.subr.mxu1 %v1091_v1  ;;  %1023 = vmatprep.mubr.msk.f32.mxu0 %vm1092_vm0, %v1091_v1 }
  0x1c   : > { %1027 = vmatpush3.msk.msra.mxu1 %vm285_vm1, %v959_v5  ;;  %1028 = vmatprep.mubr.msk.f32.mxu1 %vm1092_vm0, %v1091_v1 }
  0x1d   : > { %1024 = vmatmul.mubr.msk.f32.vlgmr.msra.gmra.mxu0 %vm281_vm3, %v974_v10  ;;  %1031 = vmatprep.subr.mxu0 %v1091_v1 }
  0x1e   : > { %1029 = vmatmul.mubr.msk.f32.vlgmr.msra.gmra.mxu1 %vm281_vm3, %v978_v11  ;;  %1035 = vmatprep.mubr.msk.f32.mxu0 %vm1092_vm0, %v1091_v1 }
  0x1f   : > { %1032 = vmatpush3.msra.mxu0 %v758_v12 }
  0x20   : > { %1033 = vmatprep.subr.mxu0 %v1091_v1 }
  0x21   : > { %1034 = vmatpush3.msra.mxu0 %v757_v13 }
  0xd5   : > { %v355_v16 = vpop.f32.mrf.mxu0 }
  0xd6   : > { %v360_v17 = vmul.f32 %v359_v14, %v355_v16  ;;  %v433_v18 = vpop.f32.mrf.mxu1 }
  0xd7   : > { %v439_v19 = vmul.f32 %v965_v15, %v433_v18  ;;  %v1005_v20 = vpop.f32.mrf.mxu0 }
  0xd8   : > { %v1010_v22 = vpop.f32.mrf.mxu1 }
  0xd9   : > { %v512_v24 = vpop.f32.mrf.mxu0  ;;  %v440_v25 = vadd.f32 %v439_v19, %v360_v17 }
  0xda   : > { %v518_v26 = vmul.f32 %v969_v21, %v512_v24  ;;  %v591_v27 = vpop.f32.mrf.mxu1 }
  0xdb   : > { %v597_v28 = vmul.f32 %v973_v23, %v591_v27  ;;  %v1015_v29 = vpop.f32.mrf.mxu0 }
  0xdc   : > { %v519_v31 = vadd.f32 %v518_v26, %v440_v25  ;;  %v1020_v32 = vpop.f32.mrf.mxu1 }
  0xdd   : > { %v670_v34 = vpop.f32.mrf.mxu0 }
  0xde   : > { %v598_v35 = vadd.f32 %v597_v28, %v519_v31  ;;  %v676_v36 = vmul.f32 %v977_v30, %v670_v34  ;;  %v749_v37 = vpop.f32.mrf.mxu1 }
  0xdf   : > { %v755_v38 = vmul.f32 %v981_v33, %v749_v37  ;;  %v1025_v39 = vpop.f32.mrf.mxu0 }
  0xe0   : > { %v677_v40 = vadd.f32 %v676_v36, %v598_v35  ;;  %v1030_v41 = vpop.f32.mrf.mxu1 }
  0xe2   : > { %v756_v42 = vadd.f32 %v755_v38, %v677_v40 }
  0xe4   : > { %1036 = vmatmul.mubr.msk.f32.vlgmr.msra.gmra.mxu0 %vm760_vm4, %v756_v42 }
 0x1a4   : > { %v830_v44 = vpop.f32.mrf.mxu0 }
 0x1a5   : > { %v831_v45 = vadd.f32 %v830_v44, %v759_v43 }
 0x1a6   : > { %v1037_v46 = vpop.f32.mrf.mxu0 }
 0x1a7   : > { %v835_v47 = vmin.f32 %v831_v45, 0.0  ;;  %vm834_vm6 = vcmp.gt.f32.partialorder %v831_v45, 0.0 }
 0x1a9   : > { %v836_v48 = vmul.f32 1.442695, %v835_v47 }
 0x1ab   : > { %1065 = vpow2.f32 %v836_v48 }
 0x1b8   : > { %v1066_v49 = vpop.eup %1065 }
 0x1b9   : > { %v983_v50 = vadd.f32 -1.0, %v1066_v49 }
 0x1bb   : > { %v839_v51 = vsel %vm834_vm6, %v831_v45, %v983_v50 }
 0x1bc   : > { %841 = vst.msk [vmem:[%s260_s22] sm:$0xff] %vm840_vm5, %v839_v51 }
 0x1bd PF: > { %s14_s17 = sadd.s32 1, %s1089_s17   ;;  %s1206_s15 = smov %s1085_s16 }
 0x1be   : > { %p11_p5 = scmp.ge.s32.totalorder %s14_s17, 4   ;;  %s1207_s16 = smov %s1209_s18 }
 0x1c0   :  { %13 = sbr.rel (!%p11_p5) target bundleno = 2 (0x2), region = 82 }

// kernel: mc_fixed_enc_forward.3
= control target key start
LH: loop header
LB: loop body
LE: loop exit
PB: predicated region body
PF: predicated region fallthrough
CT: control target
= control target key end

     0   :  { %9 = vsyncpa [#allocation3], 0  ;;  %s1375_s0 = inlined_call_operand.vmem [shape: f32[2,6,4,8], index: 0, kind: input, shape index: {}]   ;;  %s1376_s1 = inlined_call_operand.vmem [shape: f32[6,4,32], index: 1, kind: input, shape index: {}]   ;;  %s1377_s2 = inlined_call_operand.vmem [shape: f32[32,16], index: 2, kind: input, shape index: {}]   ;;  %s1378_s3 = inlined_call_operand.vmem [shape: f32[4,16], index: 3, kind: input, shape index: {}]   ;;  %s1379_s4 = inlined_call_operand.hbm [shape: f32[2,4,16], index: 4, kind: output, shape index: {}]  }
   0x1   :  { %11 = vsyncpa [#allocation3 + $0x1], 0  ;;  %s1208_s15 = smov 0   ;;  %s1210_s16 = smov 0  }
   0x2   :  { %s1212_s17 = smov 0   ;;  %s1214_s18 = smov 0  }
   0x3   :  { %s1216_s19 = smov 0   ;;  %s1218_s20 = smov 0  }
   0x4 LB: > { %s947_s21 = sadd.s32 4294967295, %s1177_s20   ;;  %s948_s22 = sadd.s32 4294967294, %s1177_s20   ;;  %s1177_s20 = sphi %s1218_s20, %s17_s20   ;;  %s1173_s19 = sphi %s1216_s19, %s1388_s19   ;;  %s1169_s18 = sphi %s1214_s18, %s1387_s18   ;;  %s1165_s17 = sphi %s1212_s17, %s1386_s17   ;;  %s1161_s16 = sphi %s1210_s16, %s1385_s16   ;;  %s1157_s15 = sphi %s1208_s15, %s1384_s15  }
   0x5   : > { %s29_s23 = sadd.s32 1, %s1173_s19  ;;  %s139_s24 = sadd.s32 1, %s1165_s17 }
   0x6   : > { %p31_p0 = scmp.ge.s32.totalorder %s29_s23, 2  ;;  %p149_p1 = scmp.ne.s32.totalorder %s1165_s17, %s1161_s16 }
   0x7   : > { %p150_p2 = scmp.eq.s32.totalorder %s947_s21, 1  ;;  %p155_p3 = scmp.ne.s32.totalorder %s1161_s16, %s1157_s15 }
   0x8   : > { %s1390_s23 = smov (%p31_p0, %s29_s23), 0  ;;  %p156_p5 = scmp.eq.s32.totalorder %s948_s22, 1 }
   0x9   : > { %p1248_p4 = por %p150_p2, %p149_p1  ;;  %s134_s26 = ssub.s32 %s1173_s19, %s1390_s23 }
   0xa   : > { %p953_p6 = scmp.ge.s32.totalorder %s1177_s20, 1  ;;  %p137_p7 = scmp.eq.s32.totalorder %s134_s26, 0 }
   0xb   : > { %p1255_p8 = por %p156_p5, %p155_p3  ;;  %p202_p9 = scmp.lt.s32.totalorder %s1177_s20, 3 }
   0xc   : > { %s1261_s28 = scalar_select %p137_p7, %s1165_s17, %s139_s24  }
   0xd   : > { %p203_p10 = pnand %p953_p6, %p202_p9 }
   0xe   : > { %p239_p11 = scmp.lt.s32.totalorder (!%p203_p10), %s1169_s18, 1  ;;  %s236_s12 = sand.u32 (!%p203_p10), 1, %s1161_s16  }
   0xf   : > { %206 = sbr.rel (%p203_p10) target bundleno = 445 (0x1bd), region = 36  ;;  %s954_s13 = sshll.u32 (!%p203_p10), %s236_s12, 2 }
  0x10   : > { %s981_s22 = sshll.u32 (!%p203_p10), %s1169_s18, 6  ;;  %s238_s24 = scalar_lea.vmem (!%p203_p10), [#allocation2], %s954_s13 }
  0x11   : > { %s843_s26 = sshll.u32 (!%p203_p10), %s238_s24, 4  ;;  %s1335_s5 = scalar_lea.hbm (!%p203_p10), %s1379_s4, %s981_s22  ;;  %s844_s26 = int_to_ptr.vmem [resolvable:$true] %s843_s26 }
  0x12   : > { %s829_s6 = scalar_lea.sflag (!%p203_p10), [#allocation3], %s236_s12 }
  0x14   : > { %v255_v0 = vlaneseq  ;;  %v1179_v1 = vmov 0.0   ;;  %vm1180_vm0 = vmmov 0   ;;  %s240_s29 = scalar_select %p239_p11, %s1169_s18, 1  ;;  %vm275_vm1 = vcmask 64512   ;;  %v750_v13 = vld [vmem:[%s1377_s2 + $0x18] sm:$0xff]  ;;  %v749_v14 = vld [vmem:[%s1377_s2 + $0x10] sm:$0xff] }
  0x15   : > { %1001 = vmatprep.subr.mxu1 %v1179_v1  ;;  %1003 = vmatprep.mubr.msk.f32.mxu1 %vm1180_vm0, %v1179_v1  ;;  %v1181_v6 = vmov 1.0   ;;  %v748_v15 = vld [vmem:[%s1377_s2 + $0x8] sm:$0xff]  ;;  %v747_v16 = vld [vmem:[%s1377_s2] sm:$0xff]  ;;  %v974_v31 = vld [vmem:[%s1376_s1 + $0x10] sm:$0xf]  ;;  %vm752_vm3 = vcmask 261120  }
  0x16   : > { %v256_v2 = vand.u32 127, %v255_v0  ;;  %v258_v3 = vshrl.u32 %v255_v0, 7  ;;  %1011 = vmatprep.subr.mxu0 %v1179_v1  ;;  %1013 = vmatprep.mubr.msk.f32.mxu0 %vm1180_vm0, %v1179_v1  ;;  %s1042_s30 = smul.u32 24, %s240_s29  ;;  %v349_v18 = vld [vmem:[%s1376_s1] sm:$0xf]  ;;  %vm826_vm4 = vcmask 125952  }
  0x17   : > { %v962_v20 = vld [vmem:[%s1376_s1 + $0x4] sm:$0xf]  ;;  %v966_v22 = vld [vmem:[%s1376_s1 + $0x8] sm:$0xf]  ;;  %v970_v29 = vld [vmem:[%s1376_s1 + $0xc] sm:$0xf] }
  0x18   : > { %v263_v4 = vand.u32 7, %v256_v2  ;;  %s246_s7 = scalar_lea.vmem %s1375_s0, %s1042_s30  ;;  %v978_v39 = vld [vmem:[%s1376_s1 + $0x14] sm:$0xf]  ;;  %v751_v46 = vld [vmem:[%s1378_s3] sm:$0xf]  ;;  %s1182_s18 = smov [#allocation2]  }
  0x19   : > { %v274_v7 = vld [vmem:[%s246_s7] sm:$0xf]  ;;  %v963_v8 = vld [vmem:[%s246_s7 + $0x8] sm:$0xf]  ;;  %v959_v9 = vld [vmem:[%s246_s7 + $0x4] sm:$0xf] }
  0x1a   : > { %vm1267_vm2 = vcmp.eq.s32.totalorder %v263_v4, %v258_v3  ;;  %v971_v10 = vld [vmem:[%s246_s7 + $0x10] sm:$0xf]  ;;  %v967_v11 = vld [vmem:[%s246_s7 + $0xc] sm:$0xf]  ;;  %v975_v12 = vld [vmem:[%s246_s7 + $0x14] sm:$0xf] }
  0x1b   : > { %1002 = vmatpush3.msk.msra.mxu1 %vm1267_vm2, %v1181_v6  ;;  %1012 = vmatpush3.msk.msra.mxu0 %vm1267_vm2, %v1181_v6  ;;  %s1101_s7 = scalar_lea.vmem %s844_s26, 64  ;;  %s1105_s8 = sshll.u32 %s1182_s18, 4  ;;  %s1106_s8 = int_to_ptr.vmem [resolvable:$false] %s1105_s8 }
  0x1c   : > { %1004 = vmatmul.mubr.msk.f32.vlgmr.msra.gmra.mxu1 %vm275_vm1, %v274_v7  ;;  %1006 = vmatprep.subr.mxu1 %v1179_v1  ;;  %p1102_p12 = scmp.ne.s32.totalorder %s844_s26, %s1101_s7  ;;  %s1107_s9 = scalar_lea.vmem %s1106_s8, 128 }
  0x1d   : > { %1007 = vmatpush3.msk.msra.mxu1 %vm1267_vm2, %v1181_v6  ;;  %1008 = vmatprep.mubr.msk.f32.mxu1 %vm1180_vm0, %v1179_v1  ;;  %p1108_p1 = scmp.lt.s32.totalorder %s844_s26, %s1106_s8  ;;  %p1109_p2 = scmp.lt.s32.totalorder %s1107_s9, %s1101_s7 }
  0x1e   : > { %1016 = vmatprep.subr.mxu1 %v1179_v1  ;;  %1014 = vmatmul.mubr.msk.f32.vlgmr.msra.gmra.mxu0 %vm275_vm1, %v963_v8  ;;  %p1103_p13 = pnand %p1102_p12, %p1248_p4 }
  0x1f   : > { %1021 = vmatprep.subr.mxu0 %v1179_v1  ;;  %1023 = vmatprep.mubr.msk.f32.mxu0 %vm1180_vm0, %v1179_v1  ;;  %p1110_p3 = por %p1109_p2, %p1108_p1 }
  0x20   : > { %1009 = vmatmul.mubr.msk.f32.vlgmr.msra.gmra.mxu1 %vm275_vm1, %v959_v9  ;;  %1022 = vmatpush3.msk.msra.mxu0 %vm1267_vm2, %v1181_v6  ;;  %p1104_p0 = pneg %p1103_p13 }
  0x21   : > { %1017 = vmatpush3.msk.msra.mxu1 %vm1267_vm2, %v1181_v6  ;;  %1018 = vmatprep.mubr.msk.f32.mxu1 %vm1180_vm0, %v1179_v1 }
  0x22   : > { %1026 = vmatprep.subr.mxu1 %v1179_v1  ;;  %1024 = vmatmul.mubr.msk.f32.vlgmr.msra.gmra.mxu0 %vm275_vm1, %v971_v10  ;;  %p1111_p5 = pnand %p1110_p3, %p1104_p0 }
  0x23   : > { %1031 = vmatprep.subr.mxu0 %v1179_v1  ;;  %1039 = vmatprep.mubr.msk.f32.mxu0 %vm1180_vm0, %v1179_v1 }
  0x24   : > { %1019 = vmatmul.mubr.msk.f32.vlgmr.msra.gmra.mxu1 %vm275_vm1, %v967_v11  ;;  %1032 = vmatpush3.msra.mxu0 %v750_v13 }
  0x25   : > { %1027 = vmatpush3.msk.msra.mxu1 %vm1267_vm2, %v1181_v6  ;;  %1028 = vmatprep.mubr.msk.f32.mxu1 %vm1180_vm0, %v1179_v1 }
  0x26   : > { %1033 = vmatprep.subr.mxu0 %v1179_v1 }
  0x27   : > { %1034 = vmatpush3.msra.mxu0 %v749_v14 }
  0x28   : > { %1029 = vmatmul.mubr.msk.f32.vlgmr.msra.gmra.mxu1 %vm275_vm1, %v975_v12  ;;  %1035 = vmatprep.subr.mxu0 %v1179_v1 }
  0x29   : > { %1036 = vmatpush3.msra.mxu0 %v748_v15 }
  0x2a   : > { %1037 = vmatprep.subr.mxu0 %v1179_v1 }
  0x2b   : > { %1038 = vmatpush3.msra.mxu0 %v747_v16 }
  0xdc   : > { %v345_v17 = vpop.f32.mrf.mxu1 }
  0xdd   : > { %v350_v25 = vmul.f32 %v349_v18, %v345_v17 }
  0xde   : > { %v1005_v19 = vpop.f32.mrf.mxu1  ;;  %v502_v21 = vpop.f32.mrf.mxu0 }
  0xdf   : > { %v508_v27 = vmul.f32 %v966_v22, %v502_v21 }
  0xe0   : > { %v423_v23 = vpop.f32.mrf.mxu1  ;;  %v1015_v24 = vpop.f32.mrf.mxu0 }
  0xe1   : > { %v429_v26 = vmul.f32 %v962_v20, %v423_v23 }
  0xe2   : > { %v1010_v28 = vpop.f32.mrf.mxu1  ;;  %v660_v30 = vpop.f32.mrf.mxu0 }
  0xe3   : > { %v430_v32 = vadd.f32 %v429_v26, %v350_v25  ;;  %v666_v37 = vmul.f32 %v974_v31, %v660_v30 }
  0xe4   : > { %v581_v33 = vpop.f32.mrf.mxu1  ;;  %v1025_v34 = vpop.f32.mrf.mxu0 }
  0xe5   : > { %v509_v35 = vadd.f32 %v508_v27, %v430_v32  ;;  %v587_v36 = vmul.f32 %v970_v29, %v581_v33 }
  0xe6   : > { %v1020_v38 = vpop.f32.mrf.mxu1 }
  0xe7   : > { %v588_v40 = vadd.f32 %v587_v36, %v509_v35 }
  0xe8   : > { %v739_v41 = vpop.f32.mrf.mxu1 }
  0xe9   : > { %v667_v42 = vadd.f32 %v666_v37, %v588_v40  ;;  %v745_v43 = vmul.f32 %v978_v39, %v739_v41 }
  0xea   : > { %v1030_v44 = vpop.f32.mrf.mxu1 }
  0xeb   : > { %v746_v45 = vadd.f32 %v745_v43, %v667_v42 }
  0xed   : > { %1040 = vmatmul.mubr.msk.f32.vlgmr.msra.gmra.mxu0 %vm752_vm3, %v746_v45 }
 0x1ad   : > { %v822_v47 = vpop.f32.mrf.mxu0 }
 0x1ae   : > { %v823_v48 = vadd.f32 %v822_v47, %v751_v46 }
 0x1af   : > { %v1041_v49 = vpop.f32.mrf.mxu0 }
 0x1b0   : > { %827 = vst.msk [vmem:[%s238_s24] sm:$0xf] %vm826_vm4, %v823_v48 }
 0x1b1   : > { %1114 = shalt.err (!%p1111_p5)
}
 0x1b2   : > { %s1115_s10 = scalar_lea.hbm %s1335_s5, 64  ;;  %s1119_s13 = scalar_lea.hbm %s1379_s4, 128 }
 0x1b3   : > { %p1116_p6 = scmp.ne.s32.totalorder %s1335_s5, %s1115_s10  ;;  %p1120_p10 = scmp.lt.s32.totalorder %s1335_s5, %s1379_s4 }
 0x1b4   : > { %p1121_p11 = scmp.lt.s32.totalorder %s1119_s13, %s1115_s10 }
 0x1b5   : > { %p1117_p7 = pnand %p1116_p6, %p1248_p4 }
 0x1b6   : > { %p1122_p12 = por %p1121_p11, %p1120_p10 }
 0x1b7   : > { %p1118_p9 = pneg %p1117_p7 }
 0x1b9   : > { %p1123_p13 = pnand %p1122_p12, %p1118_p9 }
 0x1bb   : > { %1126 = shalt.err (!%p1123_p13)
}
 0x1bc   : > { %1043 = dma.vmem_to_hbm [thread:$0]  (%p1248_p4), %s844_s26, 64, %s1335_s5, %s829_s6  }
 0x1bd PF: > { %p1049_p0 = scmp.ge.s32.totalorder %s1177_s20, 2  ;;  %s855_s22 = sand.u32 1, %s1157_s15  }
 0x1be   : > { %s856_s24 = scalar_lea.sflag [#allocation3], %s855_s22 }
 0x1bf   : > { %p1046_p1 = pnand %p1049_p0, %p1255_p8 }
 0x1c1   : > { %p1047_p2 = pneg %p1046_p1 }
 0x1c3   : > { %1152 = dma.done.wait (%p1047_p2), %s856_s24, 64  }
 0x1c4   : > { %1154 = vsyncadd (%p1047_p2), %s856_s24, 4294967232  ;;  %s17_s20 = sadd.s32 1, %s1177_s20   ;;  %s1384_s15 = smov %s1161_s16 }
 0x1c5   : > { %p14_p3 = scmp.ge.s32.totalorder %s17_s20, 4   ;;  %s1385_s16 = smov %s1165_s17 }
 0x1c6   : > { %s1386_s17 = smov %s1261_s28  ;;  %s1387_s18 = smov %s1173_s19 }
 0x1c7   : > { %s1388_s19 = smov %s1390_s23  ;;  %16 = sbr.rel (!%p14_p3) target bundleno = 4 (0x4), region = 87 }
 0x1cc   :  { %861 = vsyncpa [#allocation3], 1 }
 0x1cd   :  { %863 = vsyncpa [#allocation3 + $0x1], 1 }

</bundles_post_ra>
